<compile_context>
chip_gen: v5e
topology: v5e:2x2
jax: 0.10.0
libtpu: 0.0.40
codegen_flags: <defaults>
</compile_context>

<pallas_src>
import math

import jax
import jax.numpy as jnp
from jax import lax
from jax.experimental import pallas as pl
from jax.experimental.pallas import tpu as pltpu

LN_EPS = 1e-12  # BertConfig.layer_norm_eps default
_INV_SQRT2 = 1.0 / math.sqrt(2.0)
_MIB = 1024 * 1024


# ----------------------------------------------------------------------------
# Kernel
# ----------------------------------------------------------------------------
def _bert_head_kernel(x_ref, w1_ref, b1_ref, lnw_ref, lnb_ref,
                      w2_ref, b2_ref, out_ref, h_scratch):
    # Transform stage (dense -> GELU -> LayerNorm): computed once per row tile
    # (at the first vocab tile) and cached in VMEM scratch for the remaining
    # vocab tiles of this row tile.
    @pl.when(pl.program_id(1) == 0)
    def _():
        h = jnp.dot(x_ref[...], w1_ref[...],
                    preferred_element_type=jnp.float32) + b1_ref[...]
        # exact (erf-based) GELU, matching torch.nn.GELU() default
        h = 0.5 * h * (1.0 + lax.erf(h * _INV_SQRT2))
        # LayerNorm over the hidden dim -- statistics kept in f32
        mean = jnp.mean(h, axis=-1, keepdims=True)
        var = jnp.mean(jnp.square(h - mean), axis=-1, keepdims=True)
        h = (h - mean) * lax.rsqrt(var + LN_EPS)
        h = h * lnw_ref[...] + lnb_ref[...]
        h_scratch[...] = h.astype(h_scratch.dtype)

    # Decoder stage (hot path): [tm, H] @ [H, tv] in bf16, f32 accumulation.
    acc = jnp.dot(h_scratch[...], w2_ref[...],
                  preferred_element_type=jnp.float32)
    out_ref[...] = (acc + b2_ref[...]).astype(out_ref.dtype)


# ----------------------------------------------------------------------------
# Tile selection (generation-aware, VMEM-budgeted)
# ----------------------------------------------------------------------------
def _vmem_capacity_bytes():
    try:
        return int(pltpu.get_tpu_info().vmem_capacity_bytes)
    except Exception:
        return 64 * _MIB  # conservative: v7x per-TensorCore VMEM


def _tile_vmem_bytes(tm, tv, H, cdt_bytes, out_bytes):
    """Working-set estimate for one grid step (double-buffered pipelined ops)."""
    dbl = 2
    return (tm * H * cdt_bytes * dbl        # x tile
            + H * H * cdt_bytes * dbl       # dense weight
            + 5 * H * 4 * dbl               # dense bias + LN params (f32)
            + H * tv * cdt_bytes * dbl      # decoder weight tile
            + tv * 4 * dbl                  # decoder bias tile
            + tm * tv * out_bytes * dbl     # output tile
            + tm * H * cdt_bytes            # persistent h_scratch
            + 2 * tm * H * 4)               # f32 transform temporaries (j == 0)


def _pick_tiles(M, V, H, cdt_bytes, out_bytes, budget, tm_req, tv_req):
    # Prefer the largest row tile (minimizes decoder-weight HBM restreams),
    # then the largest vocab tile that still fits the VMEM budget.
    tm_opts = [tm_req] if tm_req is not None else [2048, 1024, 512, 256, 128]
    tv_opts = [tv_req] if tv_req is not None else [1024, 512, 256, 128]

    def clamp_m(t):
        return M if M <= t else t

    def clamp_v(t):
        return V if V <= t else t

    for tm_c in tm_opts:
        tm_e = clamp_m(tm_c)
        for tv_c in tv_opts:
            tv_e = clamp_v(tv_c)
            if _tile_vmem_bytes(tm_e, tv_e, H, cdt_bytes, out_bytes) <= budget:
                return tm_e, tv_e
    return clamp_m(tm_opts[-1]), clamp_v(tv_opts[-1])


# ----------------------------------------------------------------------------
# Wrapper
# ----------------------------------------------------------------------------
def bert_embedding_head(x, params, *, tm=None, tv=None,
                        compute_dtype=jnp.bfloat16, out_dtype=jnp.bfloat16):
    """x: [B, S, H] -> prediction scores [B, S, V] (out_dtype, default bf16)."""
    B, S, H = x.shape
    V = params["decoder_w"].shape[1]
    M = B * S

    cdt_bytes = jnp.dtype(compute_dtype).itemsize
    out_bytes = jnp.dtype(out_dtype).itemsize

    # VMEM limit: 96 MiB on 128-MiB chips (v5e/v6e), 48 MiB on 64-MiB v7x.
    vmem_cap = _vmem_capacity_bytes()
    vmem_limit = min(96 * _MIB, int(0.75 * vmem_cap))
    budget = int(0.85 * vmem_limit)
    tm_eff, tv_eff = _pick_tiles(M, V, H, cdt_bytes, out_bytes, budget, tm, tv)

    # cdiv grid: Pallas masks partial edge blocks -- no padding, no post-slice.
    grid = (pl.cdiv(M, tm_eff), pl.cdiv(V, tv_eff))

    # Wrapper-side one-time casts (cheap relative to the logits matmul).
    x2 = x.reshape(M, H).astype(compute_dtype)
    w1 = params["dense_w"].astype(compute_dtype)
    b1 = params["dense_b"].reshape(1, H).astype(jnp.float32)
    lnw = params["ln_w"].reshape(1, H).astype(jnp.float32)
    lnb = params["ln_b"].reshape(1, H).astype(jnp.float32)
    w2 = params["decoder_w"].astype(compute_dtype)
    b2 = params["decoder_b"].reshape(1, V).astype(jnp.float32)

    cost = pl.CostEstimate(
        flops=2 * M * H * H + 2 * M * H * V,
        transcendentals=M * H,
        bytes_accessed=(M * H * cdt_bytes                 # activations in
                        + H * H * cdt_bytes               # dense weight
                        + grid[0] * H * V * cdt_bytes     # decoder weight restream
                        + M * V * out_bytes),             # logits out
    )

    out = pl.pallas_call(
        _bert_head_kernel,
        out_shape=jax.ShapeDtypeStruct((M, V), out_dtype),
        grid_spec=pltpu.PrefetchScalarGridSpec(
            num_scalar_prefetch=0,
            grid=grid,
            in_specs=[
                pl.BlockSpec((tm_eff, H), lambda i, j: (i, 0)),   # x tile (bf16)
                pl.BlockSpec((H, H), lambda i, j: (0, 0)),        # dense weight (bf16)
                pl.BlockSpec((1, H), lambda i, j: (0, 0)),        # dense bias (f32)
                pl.BlockSpec((1, H), lambda i, j: (0, 0)),        # LN weight (f32)
                pl.BlockSpec((1, H), lambda i, j: (0, 0)),        # LN bias (f32)
                pl.BlockSpec((H, tv_eff), lambda i, j: (0, j)),   # decoder weight (bf16)
                pl.BlockSpec((1, tv_eff), lambda i, j: (0, j)),   # decoder bias (f32)
            ],
            out_specs=pl.BlockSpec((tm_eff, tv_eff), lambda i, j: (i, j)),
            scratch_shapes=[pltpu.VMEM((tm_eff, H), compute_dtype)],
        ),
        compiler_params=pltpu.CompilerParams(
            # Row axis independent -> shard across TensorCores (v7x megacore);
            # vocab axis must stay sequential for the scratch-reuse pattern.
            dimension_semantics=("parallel", "arbitrary"),
            vmem_limit_bytes=vmem_limit,
        ),
        cost_estimate=cost,
    )(x2, w1, b1, lnw, lnb, w2, b2)

    return out.reshape(B, S, V)


# ----------------------------------------------------------------------------
# Pure-JAX reference mirroring the kernel's mixed-precision numerics
# ----------------------------------------------------------------------------
def _reference(x, params, compute_dtype=jnp.bfloat16):
    B, S, H = x.shape
    xf = x.reshape(-1, H).astype(compute_dtype)
    h = jnp.dot(xf, params["dense_w"].astype(compute_dtype),
                preferred_element_type=jnp.float32) + params["dense_b"]
    h = 0.5 * h * (1.0 + lax.erf(h * _INV_SQRT2))
    mean = jnp.mean(h, axis=-1, keepdims=True)
    var = jnp.mean(jnp.square(h - mean), axis=-1, keepdims=True)
    h = (h - mean) * lax.rsqrt(var + LN_EPS)
    h = h * params["ln_w"] + params["ln_b"]
    out = jnp.dot(h.astype(compute_dtype),
                  params["decoder_w"].astype(compute_dtype),
                  preferred_element_type=jnp.float32) + params["decoder_b"]
    return out.reshape(B, S, -1)  # f32


def init_params(key, hidden_size, vocab_size):
    k1, k2, k3 = jax.random.split(key, 3)
    scale = 0.02
    return {
        # stored already transposed to [in, out] for the kernel matmuls
        "dense_w": scale * jax.random.normal(k1, (hidden_size, hidden_size), jnp.float32),
        "dense_b": scale * jax.random.normal(k2, (hidden_size,), jnp.float32),
        "ln_w": jnp.ones((hidden_size,), jnp.float32),
        "ln_b": jnp.zeros((hidden_size,), jnp.float32),
        "decoder_w": scale * jax.random.normal(k3, (hidden_size, vocab_size), jnp.float32),
        "decoder_b": jnp.zeros((vocab_size,), jnp.float32),  # nn.Parameter(torch.zeros(vocab))
    }


if __name__ == "__main__":
    key = jax.random.PRNGKey(0)

    # --- Test 1: small shapes, single block (grid (1,1)) ---------------------
    B, S, H, V = 2, 8, 32, 256
    kx, kp, kx2, kp2 = jax.random.split(key, 4)
    x = jax.random.normal(kx, (B, S, H), jnp.float32)
    params = init_params(kp, H, V)

    out = jax.block_until_ready(bert_embedding_head(x, params))
    ref = _reference(x, params)
    assert out.shape == (B, S, V)
    err = float(jnp.max(jnp.abs(out.astype(jnp.float32) - ref)))
    assert jnp.allclose(out.astype(jnp.float32), ref, atol=2e-2, rtol=2e-2), err

    # --- Test 2: multi-block grid with partial edge blocks in both axes ------
    B2, S2, H2, V2 = 2, 80, 64, 384           # M=160 (tm=128 -> partial rows),
    x2 = jax.random.normal(kx2, (B2, S2, H2), jnp.float32)
    params2 = init_params(kp2, H2, V2)         # V=384 (tv=256 -> partial vocab)

    out2 = jax.block_until_ready(
        bert_embedding_head(x2, params2, tm=128, tv=256))
    ref2 = _reference(x2, params2)
    assert out2.shape == (B2, S2, V2)
    err2 = float(jnp.max(jnp.abs(out2.astype(jnp.float32) - ref2)))
    assert jnp.allclose(out2.astype(jnp.float32), ref2, atol=2e-2, rtol=2e-2), err2

    print("KERNEL_OK")
</pallas_src>

<mosaic_0001>
module attributes {stable_mosaic.version = 11 : i64} {
  func.func @_bert_head_kernel(%arg0: i32, %arg1: i32, %arg2: memref<16x32xbf16, #tpu.memory_space<vmem>>, %arg3: memref<32x32xbf16, #tpu.memory_space<vmem>>, %arg4: memref<1x32xf32, #tpu.memory_space<vmem>>, %arg5: memref<1x32xf32, #tpu.memory_space<vmem>>, %arg6: memref<1x32xf32, #tpu.memory_space<vmem>>, %arg7: memref<32x256xbf16, #tpu.memory_space<vmem>>, %arg8: memref<1x256xf32, #tpu.memory_space<vmem>>, %arg9: memref<16x256xbf16, #tpu.memory_space<vmem>>, %arg10: memref<16x32xbf16, #tpu.memory_space<vmem>>) attributes {dimension_semantics = [#tpu.dimension_semantics<parallel>, #tpu.dimension_semantics<arbitrary>], iteration_bounds = array<i64: 1, 1>, scalar_prefetch = 0 : i64, scratch_operands = 1 : i64, tpu.core_type = #tpu.core_type<tc>, window_params = [{transform_indices = @transform_0, window_bounds = array<i64: 16, 32>}, {pipeline_mode = #tpu.pipeline_mode<synchronous>, transform_indices = @transform_1, window_bounds = array<i64: 32, 32>}, {pipeline_mode = #tpu.pipeline_mode<synchronous>, transform_indices = @transform_2, window_bounds = array<i64: 1, 32>}, {pipeline_mode = #tpu.pipeline_mode<synchronous>, transform_indices = @transform_3, window_bounds = array<i64: 1, 32>}, {pipeline_mode = #tpu.pipeline_mode<synchronous>, transform_indices = @transform_4, window_bounds = array<i64: 1, 32>}, {transform_indices = @transform_5, window_bounds = array<i64: 32, 256>}, {transform_indices = @transform_6, window_bounds = array<i64: 1, 256>}, {transform_indices = @transform_7, window_bounds = array<i64: 16, 256>}]} {
    %c0_i32 = arith.constant 0 : i32
    %0 = arith.cmpi eq, %arg1, %c0_i32 : i32
    %1 = arith.extui %0 : i1 to i32
    %c0_i32_0 = arith.constant 0 : i32
    %2 = arith.cmpi ne, %1, %c0_i32_0 : i32
    scf.if %2 {
      %c0_8 = arith.constant 0 : index
      %c0_9 = arith.constant 0 : index
      %11 = vector.load %arg2[%c0_8, %c0_9] : memref<16x32xbf16, #tpu.memory_space<vmem>>, vector<16x32xbf16>
      %c0_10 = arith.constant 0 : index
      %c0_11 = arith.constant 0 : index
      %12 = vector.load %arg3[%c0_10, %c0_11] : memref<32x32xbf16, #tpu.memory_space<vmem>>, vector<32x32xbf16>
      %cst_12 = arith.constant dense<0.000000e+00> : vector<16x32xf32>
      %13 = tpu.matmul %11, %12, %cst_12 {dimension_numbers = #tpu.dot_dimension_numbers<[1], [0], [0], [1], [0, 0, 1, 1], [], []>} : vector<16x32xbf16>, vector<32x32xbf16>, vector<16x32xf32> -> vector<16x32xf32>
      %c0_13 = arith.constant 0 : index
      %c0_14 = arith.constant 0 : index
      %14 = vector.load %arg4[%c0_13, %c0_14] : memref<1x32xf32, #tpu.memory_space<vmem>>, vector<1x32xf32>
      %15 = vector.broadcast %14 : vector<1x32xf32> to vector<16x32xf32>
      %16 = arith.addf %13, %15 : vector<16x32xf32>
      %cst_15 = arith.constant 5.000000e-01 : f32
      %17 = vector.broadcast %cst_15 : f32 to vector<16x32xf32>
      %18 = arith.mulf %17, %16 : vector<16x32xf32>
      %cst_16 = arith.constant 0.707106769 : f32
      %19 = vector.broadcast %cst_16 : f32 to vector<16x32xf32>
      %20 = arith.mulf %16, %19 : vector<16x32xf32>
      %21 = math.erf %20 : vector<16x32xf32>
      %cst_17 = arith.constant 1.000000e+00 : f32
      %22 = vector.broadcast %cst_17 : f32 to vector<16x32xf32>
      %23 = arith.addf %22, %21 : vector<16x32xf32>
      %24 = arith.mulf %18, %23 : vector<16x32xf32>
      %cst_18 = arith.constant dense<0.000000e+00> : vector<16xf32>
      %25 = vector.multi_reduction <add>, %24, %cst_18 [1] : vector<16x32xf32> to vector<16xf32>
      %26 = vector.shape_cast %25 : vector<16xf32> to vector<16x1xf32>
      %cst_19 = arith.constant 3.200000e+01 : f32
      %27 = vector.broadcast %cst_19 : f32 to vector<16x1xf32>
      %28 = arith.divf %26, %27 : vector<16x1xf32>
      %29 = vector.broadcast %28 : vector<16x1xf32> to vector<16x32xf32>
      %30 = arith.subf %24, %29 : vector<16x32xf32>
      %31 = arith.mulf %30, %30 : vector<16x32xf32>
      %cst_20 = arith.constant dense<0.000000e+00> : vector<16xf32>
      %32 = vector.multi_reduction <add>, %31, %cst_20 [1] : vector<16x32xf32> to vector<16xf32>
      %33 = vector.shape_cast %32 : vector<16xf32> to vector<16x1xf32>
      %cst_21 = arith.constant 3.200000e+01 : f32
      %34 = vector.broadcast %cst_21 : f32 to vector<16x1xf32>
      %35 = arith.divf %33, %34 : vector<16x1xf32>
      %36 = vector.broadcast %28 : vector<16x1xf32> to vector<16x32xf32>
      %37 = arith.subf %24, %36 : vector<16x32xf32>
      %cst_22 = arith.constant 9.99999996E-13 : f32
      %38 = vector.broadcast %cst_22 : f32 to vector<16x1xf32>
      %39 = arith.addf %35, %38 : vector<16x1xf32>
      %40 = math.rsqrt %39 : vector<16x1xf32>
      %41 = vector.broadcast %40 : vector<16x1xf32> to vector<16x32xf32>
      %42 = arith.mulf %37, %41 : vector<16x32xf32>
      %c0_23 = arith.constant 0 : index
      %c0_24 = arith.constant 0 : index
      %43 = vector.load %arg5[%c0_23, %c0_24] : memref<1x32xf32, #tpu.memory_space<vmem>>, vector<1x32xf32>
      %44 = vector.broadcast %43 : vector<1x32xf32> to vector<16x32xf32>
      %45 = arith.mulf %42, %44 : vector<16x32xf32>
      %c0_25 = arith.constant 0 : index
      %c0_26 = arith.constant 0 : index
      %46 = vector.load %arg6[%c0_25, %c0_26] : memref<1x32xf32, #tpu.memory_space<vmem>>, vector<1x32xf32>
      %47 = vector.broadcast %46 : vector<1x32xf32> to vector<16x32xf32>
      %48 = arith.addf %45, %47 : vector<16x32xf32>
      %49 = arith.truncf %48 : vector<16x32xf32> to vector<16x32xbf16>
      %c0_27 = arith.constant 0 : index
      %c0_28 = arith.constant 0 : index
      %50 = vector.load %arg10[%c0_27, %c0_28] : memref<16x32xbf16, #tpu.memory_space<vmem>>, vector<16x32xbf16>
      tpu.vector_store %arg10[%c0_27, %c0_28], %49 {strides = array<i32>} : memref<16x32xbf16, #tpu.memory_space<vmem>>, vector<16x32xbf16>,
    } else {
    }
    %c0 = arith.constant 0 : index
    %c0_1 = arith.constant 0 : index
    %3 = vector.load %arg10[%c0, %c0_1] : memref<16x32xbf16, #tpu.memory_space<vmem>>, vector<16x32xbf16>
    %c0_2 = arith.constant 0 : index
    %c0_3 = arith.constant 0 : index
    %4 = vector.load %arg7[%c0_2, %c0_3] : memref<32x256xbf16, #tpu.memory_space<vmem>>, vector<32x256xbf16>
    %cst = arith.constant dense<0.000000e+00> : vector<16x256xf32>
    %5 = tpu.matmul %3, %4, %cst {dimension_numbers = #tpu.dot_dimension_numbers<[1], [0], [0], [1], [0, 0, 1, 1], [], []>} : vector<16x32xbf16>, vector<32x256xbf16>, vector<16x256xf32> -> vector<16x256xf32>
    %c0_4 = arith.constant 0 : index
    %c0_5 = arith.constant 0 : index
    %6 = vector.load %arg8[%c0_4, %c0_5] : memref<1x256xf32, #tpu.memory_space<vmem>>, vector<1x256xf32>
    %7 = vector.broadcast %6 : vector<1x256xf32> to vector<16x256xf32>
    %8 = arith.addf %5, %7 : vector<16x256xf32>
    %9 = arith.truncf %8 : vector<16x256xf32> to vector<16x256xbf16>
    %c0_6 = arith.constant 0 : index
    %c0_7 = arith.constant 0 : index
    %10 = vector.load %arg9[%c0_6, %c0_7] : memref<16x256xbf16, #tpu.memory_space<vmem>>, vector<16x256xbf16>
    tpu.vector_store %arg9[%c0_6, %c0_7], %9 {strides = array<i32>} : memref<16x256xbf16, #tpu.memory_space<vmem>>, vector<16x256xbf16>,
    return
  }
  func.func @transform_0(%arg0: i32, %arg1: i32) -> (i32, i32) {
    %c0_i32 = arith.constant 0 : i32
    %c0_i32_0 = arith.constant 0 : i32
    return %arg0, %c0_i32 : i32, i32
  }
  func.func @transform_1(%arg0: i32, %arg1: i32) -> (i32, i32) {
    %c0_i32 = arith.constant 0 : i32
    %c0_i32_0 = arith.constant 0 : i32
    %c0_i32_1 = arith.constant 0 : i32
    return %c0_i32, %c0_i32_0 : i32, i32
  }
  func.func @transform_2(%arg0: i32, %arg1: i32) -> (i32, i32) {
    %c0_i32 = arith.constant 0 : i32
    %c0_i32_0 = arith.constant 0 : i32
    %c0_i32_1 = arith.constant 0 : i32
    return %c0_i32, %c0_i32_0 : i32, i32
  }
  func.func @transform_3(%arg0: i32, %arg1: i32) -> (i32, i32) {
    %c0_i32 = arith.constant 0 : i32
    %c0_i32_0 = arith.constant 0 : i32
    %c0_i32_1 = arith.constant 0 : i32
    return %c0_i32, %c0_i32_0 : i32, i32
  }
  func.func @transform_4(%arg0: i32, %arg1: i32) -> (i32, i32) {
    %c0_i32 = arith.constant 0 : i32
    %c0_i32_0 = arith.constant 0 : i32
    %c0_i32_1 = arith.constant 0 : i32
    return %c0_i32, %c0_i32_0 : i32, i32
  }
  func.func @transform_5(%arg0: i32, %arg1: i32) -> (i32, i32) {
    %c0_i32 = arith.constant 0 : i32
    %c0_i32_0 = arith.constant 0 : i32
    return %c0_i32, %arg1 : i32, i32
  }
  func.func @transform_6(%arg0: i32, %arg1: i32) -> (i32, i32) {
    %c0_i32 = arith.constant 0 : i32
    %c0_i32_0 = arith.constant 0 : i32
    return %c0_i32, %arg1 : i32, i32
  }
  func.func @transform_7(%arg0: i32, %arg1: i32) -> (i32, i32) {
    %c0_i32 = arith.constant 0 : i32
    return %arg0, %arg1 : i32, i32
  }
}

</mosaic_0001>

<bundles_post_ra>
// kernel: tpu_custom_call.1
= control target key start
LH: loop header
LB: loop body
LE: loop exit
PB: predicated region body
PF: predicated region fallthrough
CT: control target
= control target key end

     0   :  { %12 = vsyncpa [#allocation4], 0  ;;  %s723_s0 = inlined_call_operand.hbm [shape: bf16[16,32], index: 0, kind: input, shape index: {}]   ;;  %s724_s1 = inlined_call_operand.hbm [shape: bf16[32,32], index: 1, kind: input, shape index: {}]   ;;  %s725_s2 = inlined_call_operand.vmem [shape: f32[1,32], index: 2, kind: input, shape index: {}]   ;;  %s726_s3 = inlined_call_operand.hbm [shape: f32[1,32], index: 3, kind: input, shape index: {}]   ;;  %s727_s4 = inlined_call_operand.hbm [shape: f32[1,32], index: 4, kind: input, shape index: {}]   ;;  %s728_s5 = inlined_call_operand.hbm [shape: bf16[32,256], index: 5, kind: input, shape index: {}]   ;;  %s729_s6 = inlined_call_operand.vmem [shape: f32[1,256], index: 6, kind: input, shape index: {}]   ;;  %s730_s7 = inlined_call_operand.hbm [shape: bf16[16,256], index: 7, kind: output, shape index: {}]  }
   0x1   :  { %13 = vsyncpa [#allocation7], 0 }
   0x2   :  { %14 = vsyncpa [#allocation10], 0 }
   0x3   :  { %15 = vsyncpa [#allocation5], 0  ;;  %s33_s26 = sshll.u32 %s724_s1, 4  ;;  %s622_s27 = smov [#allocation6]   ;;  %s34_s26 = int_to_ptr.hbm [resolvable:$true] %s33_s26 }
   0x4   :  { %s35_s28 = sshll.u32 %s622_s27, 4  ;;  %s60_s8 = sshll.u32 %s727_s4, 4  ;;  %s36_s28 = int_to_ptr.vmem [resolvable:$true] %s35_s28  ;;  %s61_s8 = int_to_ptr.hbm [resolvable:$true] %s60_s8 }
   0x5   :  { %s623_s9 = smov 64   ;;  %s624_s10 = smov 4  }
   0x6   :  { %41 = dma.hbm_to_vmem [thread:$0]  %s34_s26, 256, %s36_s28, [#allocation7], %s623_s9, %s623_s9, %s624_s10  }
   0x7   :  { %s625_s11 = smov [#allocation9]   ;;  %s20_s15 = sshll.u32 %s723_s0, 4  ;;  %s21_s15 = int_to_ptr.hbm [resolvable:$true] %s20_s15 }
   0x8   :  { %s62_s12 = sshll.u32 %s625_s11, 4  ;;  %s49_s17 = sshll.u32 %s726_s3, 4  ;;  %s63_s12 = int_to_ptr.vmem [resolvable:$true] %s62_s12  ;;  %s50_s17 = int_to_ptr.hbm [resolvable:$true] %s49_s17 }
   0x9   :  { %65 = dma.hbm_to_vmem [thread:$0]  %s61_s8, 16, %s63_s12, [#allocation10]  }
   0xa   :  { %s626_s18 = smov [#allocation3]   ;;  %s627_s4 = smov [#allocation8]  }
   0xb   :  { %s22_s19 = sshll.u32 %s626_s18, 4  ;;  %s51_s20 = sshll.u32 %s627_s4, 4  ;;  %s23_s19 = int_to_ptr.vmem [resolvable:$true] %s22_s19  ;;  %s52_s20 = int_to_ptr.vmem [resolvable:$true] %s51_s20 }
   0xc   :  { %28 = dma.hbm_to_vmem [thread:$0]  %s21_s15, 128, %s23_s19, [#allocation4], %s623_s9, %s623_s9, %s624_s10  }
   0xd   :  { %s70_s23 = sshll.u32 %s728_s5, 4  ;;  %s628_s0 = smov [#allocation11]   ;;  %s71_s23 = int_to_ptr.hbm [resolvable:$true] %s70_s23 }
   0xe   :  { %54 = dma.hbm_to_vmem [thread:$0]  %s50_s17, 16, %s52_s20, [#allocation7]  }
   0xf   :  { %s72_s24 = sshll.u32 %s628_s0, 4  ;;  %s629_s25 = smov 128   ;;  %s73_s24 = int_to_ptr.vmem [resolvable:$true] %s72_s24 }
  0x10   :  { %s630_s26 = smov 8  }
  0x11   :  { %78 = dma.hbm_to_vmem [thread:$0]  %s71_s23, 512, %s73_s24, [#allocation10], %s629_s25, %s629_s25, %s630_s26  }
  0x12   :  { %614 = dma.done.wait [#allocation4], 128  }
  0x13   :  { %615 = vsyncadd [#allocation4], 4294967168 }
  0x14   :  { %616 = dma.done.wait [#allocation7], 272  }
  0x15   :  { %617 = vsyncadd [#allocation7], 4294967024 }
  0x16   :  { %618 = dma.done.wait [#allocation10], 528  }
  0x17   :  { %619 = vsyncadd [#allocation10], 4294966768  ;;  %v440_v0 = vld [vmem:[#allocation6 + $0x8] sm:$0xff]  ;;  %v439_v1 = vld [vmem:[#allocation6] sm:$0xff]  ;;  %vm133_vm0 = vcmask 261120   ;;  %vm304_vm14 = vcmask 257024  }
  0x18   :  { %143 = vmatpush.bf16.msra.mxu0 %v440_v0  ;;  %v438_v2 = vld [vmem:[#allocation3] sm:$0xff]  ;;  %v457_v3 = vld [vmem:[%s725_s2] ss:$0 sm:$0xff]  ;;  %s632_s28 = smov [#allocation12]   ;;  %s386_s9 = sshll.u32 %s730_s7, 4  ;;  %s387_s9 = int_to_ptr.hbm [resolvable:$true] %s386_s9 }
  0x19   :  { %s384_s29 = sshll.u32 %s632_s28, 4  ;;  %s385_s29 = int_to_ptr.vmem [resolvable:$true] %s384_s29 }
  0x1c   :  { %144 = vmatpush.bf16.msra.mxu0 %v439_v1 }
  0x1f   :  { %413 = vmatmul.msk.bf16.vlgmr.msra.gmra.mxu0 %vm133_vm0, %v438_v2 }
  0x9c   :  { %v146_v4 = vpop.f32.mrf.mxu0 }
  0x9d   :  { %v695_v5 = vadd.f32 %v457_v3, %v146_v4 }
  0x9f   :  { %v153_v6 = vmul.f32 0.70710677, %v695_v5 }
  0xa1   :  { %v155_v7 = vmul.f32 %v153_v6, %v153_v6 }
  0xa3   :  { %v156_v8 = vmin.f32 %v155_v7, 16.0 }
  0xa4   :  { %v148_v9 = vpop.f32.mrf.mxu0 }
  0xa5   :  { %v157_v10 = vmul.f32 2.1237322e-06, %v156_v8  ;;  %v698_v11 = vadd.f32 %v457_v3, %v148_v9  ;;  %v168_v12 = vmul.f32 3.8918573e-05, %v156_v8 }
  0xa7   :  { %v158_v13 = vadd.f32 0.00028619796, %v157_v10  ;;  %v701_v14 = vmul.f32 0.70710677, %v698_v11  ;;  %v169_v15 = vadd.f32 0.001143296, %v168_v12 }
  0xa9   :  { %v159_v16 = vmul.f32 %v158_v13, %v156_v8  ;;  %v195_v17 = vmul.f32 %v701_v14, %v701_v14  ;;  %v170_v18 = vmul.f32 %v169_v15, %v156_v8  ;;  %v151_v13 = vmul.f32 0.5, %v695_v5 }
  0xab   :  { %v196_v19 = vmin.f32 %v195_v17, 16.0  ;;  %v171_v20 = vadd.f32 0.014752088, %v170_v18  ;;  %v160_v21 = vadd.f32 0.0036580483, %v159_v16 }
  0xad   :  { %v197_v22 = vmul.f32 2.1237322e-06, %v196_v19  ;;  %v208_v23 = vmul.f32 3.8918573e-05, %v196_v19  ;;  %v172_v24 = vmul.f32 %v171_v20, %v156_v8  ;;  %v161_v28 = vmul.f32 %v160_v21, %v156_v8 }
  0xaf   :  { %v198_v25 = vadd.f32 0.00028619796, %v197_v22  ;;  %v209_v26 = vadd.f32 0.001143296, %v208_v23  ;;  %v173_v27 = vadd.f32 0.112945676, %v172_v24 }
  0xb0   :  { %v162_v35 = vadd.f32 0.05243302, %v161_v28  ;;  %v152_v23 = vmul.f32 0.5, %v698_v11 }
  0xb1   :  { %v199_v29 = vmul.f32 %v198_v25, %v196_v19  ;;  %v210_v30 = vmul.f32 %v209_v26, %v196_v19  ;;  %v174_v31 = vmul.f32 %v173_v27, %v156_v8  ;;  %v631_v26 = vmov 32.0  }
  0xb2   :  { %v163_v41 = vmul.f32 %v162_v35, %v156_v8 }
  0xb3   :  { %v211_v32 = vadd.f32 0.014752088, %v210_v30  ;;  %v200_v33 = vadd.f32 0.0036580483, %v199_v29  ;;  %v175_v34 = vadd.f32 0.4994258, %v174_v31 }
  0xb4   :  { %v164_v45 = vadd.f32 0.18741608, %v163_v41 }
  0xb5   :  { %v212_v36 = vmul.f32 %v211_v32, %v196_v19  ;;  %v176_v37 = vmul.f32 %v175_v34, %v156_v8  ;;  %v201_v39 = vmul.f32 %v200_v33, %v196_v19 }
  0xb6   :  { %v165_v50 = vmul.f32 %v164_v45, %v156_v8  ;;  %v445_v45 = vld [vmem:[#allocation11 + $0x14] sm:$0xf0] }
  0xb7   :  { %v213_v38 = vadd.f32 0.112945676, %v212_v36  ;;  %v177_v40 = vadd.f32 1.0, %v176_v37  ;;  %v202_v44 = vadd.f32 0.05243302, %v201_v39 }
  0xb8   :  { %v166_v55 = vadd.f32 1.1283791, %v165_v50  ;;  %v443_v50 = vld [vmem:[#allocation11 + $0x4] sm:$0xf0] }
  0xb9   :  { %v214_v42 = vmul.f32 %v213_v38, %v196_v19  ;;  %460 = vrcp.f32 %v177_v40  ;;  %v203_v49 = vmul.f32 %v202_v44, %v196_v19  ;;  %v189_v54 = vand.u32 2147483648, %v177_v40  ;;  %v430_v44 = vld [vmem:[#allocation11 + $0x10] sm:$0xf] }
  0xba   :  { %v187_v57 = vand.u32 2147483647, %v177_v40  ;;  %vm183_vm2 = vweird.f32 %v177_v40  ;;  %v167_v63 = vmul.f32 %v166_v55, %v153_v6 }
  0xbb   :  { %v215_v43 = vadd.f32 0.4994258, %v214_v42  ;;  %v204_v53 = vadd.f32 0.18741608, %v203_v49  ;;  %v190_v61 = vor.u32 1.1754944e-38, %v189_v54 }
  0xbc   :  { %vm188_vm4 = vcmp.eq.f32.partialorder %v187_v57, 8.507059e+37  ;;  %v422_v49 = vld [vmem:[#allocation11] sm:$0xf]  ;;  %v424_v54 = vld [vmem:[#allocation11 + $0x8] sm:$0xf0] }
  0xbd   :  { %v216_v46 = vmul.f32 %v215_v43, %v196_v19  ;;  %v205_v60 = vmul.f32 %v204_v53, %v196_v19  ;;  %v442_v53 = vld [vmem:[#allocation11 + $0x4] sm:$0xf] }
  0xbe   :  { %v427_v57 = vor.u32 %v442_v53, %v424_v54 }
  0xbf   :  { %v217_v47 = vadd.f32 1.0, %v216_v46  ;;  %v461_v48 = vpop.eup %460  ;;  %v206_v7 = vadd.f32 1.1283791, %v205_v60  ;;  %v444_v46 = vld [vmem:[#allocation11 + $0x14] sm:$0xf] }
  0xc0   :  { %v179_v51 = vmul.f32 %v461_v48, %v177_v40  ;;  %vm184_vm1 = vweird.f32 %v461_v48 }
  0xc1   :  { %462 = vrcp.f32 %v217_v47  ;;  %vm185_vm3 = vmor %vm183_vm2, %vm184_vm1  ;;  %v229_v4 = vand.u32 2147483648, %v217_v47  ;;  %v227_v9 = vand.u32 2147483647, %v217_v47  ;;  %vm223_vm6 = vweird.f32 %v217_v47 }
  0xc2   :  { %v180_v52 = vsub.f32 1.0, %v179_v51  ;;  %v207_v6 = vmul.f32 %v206_v7, %v701_v14  ;;  %464 = vrcp.f32 %v631_v26 }
  0xc3   :  { %v230_v16 = vor.u32 1.1754944e-38, %v229_v4  ;;  %vm228_vm8 = vcmp.eq.f32.partialorder %v227_v9, 8.507059e+37 }
  0xc4   :  { %v181_v56 = vmul.f32 %v461_v48, %v180_v52 }
  0xc6   :  { %v182_v59 = vadd.f32 %v461_v48, %v181_v56  ;;  %v423_v56 = vor.u32 %v443_v50, %v422_v49 }
  0xc7   :  { %v463_v58 = vpop.eup %462 }
  0xc8   :  { %v219_v62 = vmul.f32 %v463_v58, %v217_v47  ;;  %v186_v0 = vsel %vm185_vm3, %v461_v48, %v182_v59  ;;  %vm224_vm5 = vweird.f32 %v463_v58  ;;  %v465_v27 = vpop.eup %464  ;;  %v431_v47 = vor.u32 %v445_v45, %v430_v44  ;;  %v432_v48 = vld [vmem:[#allocation11 + $0x18] sm:$0xf0] }
  0xc9   :  { %v191_v1 = vsel %vm188_vm4, %v190_v61, %v186_v0  ;;  %vm225_vm7 = vmor %vm223_vm6, %vm224_vm5  ;;  %v246_v14 = vmul.f32 32.0, %v465_v27  ;;  %vm250_vm9 = vweird.f32 %v465_v27  ;;  %v435_v52 = vor.u32 %v444_v46, %v432_v48 }
  0xca   :  { %v220_v2 = vsub.f32 1.0, %v219_v62  ;;  %v192_v3 = vmul.f32 %v191_v1, %v167_v63  ;;  %354 = vmatpush.bf16.msra.mxu1 %v431_v47 }
  0xcb   :  { %v247_v28 = vsub.f32 1.0, %v246_v14  ;;  %368 = vmatpush.bf16.msra.mxu2 %v435_v52 }
  0xcc   :  { %v221_v8 = vmul.f32 %v463_v58, %v220_v2  ;;  %v414_v10 = vclamps-f32 %v192_v3, 1.0  ;;  %v458_v3 = vld [vmem:[#allocation8] ss:$0 sm:$0xff] }
  0xcd   :  { %v248_v29 = vmul.f32 %v465_v27, %v247_v28 }
  0xce   :  { %v222_v12 = vadd.f32 %v463_v58, %v221_v8  ;;  %v235_v15 = vadd.f32 1.0, %v414_v10  ;;  %355 = vmatpush.bf16.msra.mxu1 %v423_v56  ;;  %v459_v8 = vld [vmem:[#allocation9] ss:$0 sm:$0xff] }
  0xcf   :  { %v249_v30 = vadd.f32 %v465_v27, %v248_v29  ;;  %369 = vmatpush.bf16.msra.mxu2 %v427_v57 }
  0xd0   :  { %v226_v17 = vsel %vm225_vm7, %v463_v58, %v222_v12  ;;  %v237_v18 = vmul.f32 %v235_v15, %v151_v13 }
  0xd1   :  { %v231_v19 = vsel %vm228_vm8, %v230_v16, %v226_v17  ;;  %v251_v31 = vsel %vm250_vm9, %v465_v27, %v249_v30 }
  0xd2   :  { %v232_v20 = vmul.f32 %v231_v19, %v207_v6  ;;  %v239_v21 = vsel %vm133_vm0, %v237_v18, 0.0 }
  0xd3   :  { %240 = vadd.xlane.f32.xlu0 %v239_v21 }
  0xd4   :  { %v415_v22 = vclamps-f32 %v232_v20, 1.0 }
  0xd6   :  { %v236_v24 = vadd.f32 1.0, %v415_v22 }
  0xd8   :  { %v238_v25 = vmul.f32 %v236_v24, %v152_v23  ;;  %v313_v23 = vld [vmem:[%s729_s6] sm:$0x3] }
  0xda   :  { %v242_v5 = vsel %vm133_vm0, %v238_v25, 0.0 }
  0xdb   :  { %243 = vadd.xlane.f32.xlu0 %v242_v5  ;;  %v316_v5 = vperm.slane %v313_v23, 1 }
 0x146   :  { %v241_v32 = vpop.xlane.xlu0 %240 }
 0x147   :  { %v252_v33 = vmul.f32 %v251_v31, %v241_v32 }
 0x149   :  { %v254_v34 = vsub.f32 %v237_v18, %v252_v33 }
 0x14b   :  { %v256_v35 = vmul.f32 %v254_v34, %v254_v34 }
 0x14d   :  { %v258_v11 = vsel %vm133_vm0, %v256_v35, 0.0 }
 0x14e   :  { %259 = vadd.xlane.f32.xlu1 %v258_v11  ;;  %v244_v36 = vpop.xlane.xlu0 %243 }
 0x14f   :  { %v253_v37 = vmul.f32 %v251_v31, %v244_v36 }
 0x151   :  { %v255_v38 = vsub.f32 %v238_v25, %v253_v37  ;;  %v315_v25 = vperm.slane %v313_v23, 0 }
 0x153   :  { %v257_v39 = vmul.f32 %v255_v38, %v255_v38 }
 0x155   :  { %v261_v40 = vsel %vm133_vm0, %v257_v39, 0.0 }
 0x156   :  { %262 = vadd.xlane.f32.xlu1 %v261_v40 }
 0x1c1   :  { %v260_v41 = vpop.xlane.xlu1 %259 }
 0x1c2   :  { %v264_v42 = vmul.f32 %v260_v41, %v251_v31 }
 0x1c4   :  { %v266_v43 = vadd.f32 1e-12, %v264_v42 }
 0x1c6   :  { %466 = vrsqrt.f32 %v266_v43  ;;  %vm274_vm11 = vweird.f32 %v266_v43 }
 0x1c9   :  { %v263_v51 = vpop.xlane.xlu1 %262 }
 0x1ca   :  { %v265_v55 = vmul.f32 %v263_v51, %v251_v31 }
 0x1cc   :  { %v467_v58 = vpop.eup %466  ;;  %v267_v59 = vadd.f32 1e-12, %v265_v55 }
 0x1cd   :  { %v269_v60 = vmul.f32 %v467_v58, %v266_v43  ;;  %vm275_vm10 = vweird.f32 %v467_v58 }
 0x1ce   :  { %468 = vrsqrt.f32 %v267_v59  ;;  %vm276_vm12 = vmor %vm274_vm11, %vm275_vm10  ;;  %vm284_vm15 = vweird.f32 %v267_v59 }
 0x1cf   :  { %v270_v61 = vmul.f32 %v467_v58, %v269_v60 }
 0x1d1   :  { %v271_v62 = vmul.f32 0.5, %v270_v61 }
 0x1d3   :  { %v272_v63 = vsub.f32 1.5, %v271_v62 }
 0x1d4   :  { %v469_v0 = vpop.eup %468 }
 0x1d5   :  { %v273_v1 = vmul.f32 %v467_v58, %v272_v63  ;;  %v279_v2 = vmul.f32 %v469_v0, %v267_v59  ;;  %vm285_vm13 = vweird.f32 %v469_v0 }
 0x1d6   :  { %vm286_vm1 = vmor %vm284_vm15, %vm285_vm13 }
 0x1d7   :  { %v277_v4 = vsel %vm276_vm12, %v467_v58, %v273_v1  ;;  %v280_v7 = vmul.f32 %v469_v0, %v279_v2 }
 0x1d8   :  { %v288_v9 = vmul.f32 %v277_v4, %v254_v34 }
 0x1d9   :  { %v281_v10 = vmul.f32 0.5, %v280_v7 }
 0x1da   :  { %v294_v12 = vmul.f32 %v458_v3, %v288_v9 }
 0x1db   :  { %v282_v13 = vsub.f32 1.5, %v281_v10 }
 0x1dc   :  { %v300_v15 = vadd.f32 %v459_v8, %v294_v12 }
 0x1dd   :  { %v283_v16 = vmul.f32 %v469_v0, %v282_v13 }
 0x1de   :  { %v302_v6 = vpack.c.bf16 %v300_v15, %v300_v15 }
 0x1df   :  { %v287_v17 = vsel %vm286_vm1, %v469_v0, %v283_v16 }
 0x1e0   :  { %305 = vst.msk [vmem:[#allocation2] sm:$0xf] %vm304_vm14, %v302_v6  ;;  %v289_v18 = vmul.f32 %v287_v17, %v255_v38 }
 0x1e2   :  { %v295_v19 = vmul.f32 %v458_v3, %v289_v18 }
 0x1e4   :  { %v301_v20 = vadd.f32 %v459_v8, %v295_v19 }
 0x1e6   :  { %v303_v21 = vpack.c.bf16 %v301_v20, %v301_v20 }
 0x1e8   :  { %306 = vst.msk [vmem:[#allocation2 + $0x4] sm:$0xf] %vm304_vm14, %v303_v21 }
 0x1ef   :  { %v441_v22 = vld [vmem:[#allocation2] sm:$0xff] }
 0x1f0   :  { %436 = vmatmul.msk.bf16.vlgmr.msra.gmra.mxu1 %vm133_vm0, %v441_v22  ;;  %437 = vmatmul.msk.bf16.vlgmr.msra.gmra.mxu2 %vm133_vm0, %v441_v22 }
 0x26d   :  { %v357_v24 = vpop.f32.mrf.mxu1 }
 0x26e   :  { %v358_v27 = vadd.f32 %v357_v24, %v315_v25 }
 0x273   :  { %v371_v26 = vpop.f32.mrf.mxu2 }
 0x274   :  { %v372_v14 = vadd.f32 %v371_v26, %v316_v5 }
 0x275   :  { %v359_v29 = vpop.f32.mrf.mxu1 }
 0x276   :  { %v376_v28 = vpack.c.bf16 %v372_v14, %v358_v27  ;;  %v360_v31 = vadd.f32 %v359_v29, %v315_v25 }
 0x278   :  { %378 = vst [vmem:[#allocation12] sm:$0xff] %v376_v28 }
 0x27b   :  { %v373_v30 = vpop.f32.mrf.mxu2 }
 0x27c   :  { %v374_v32 = vadd.f32 %v373_v30, %v316_v5 }
 0x27e   :  { %v377_v33 = vpack.c.bf16 %v374_v32, %v360_v31 }
 0x280   :  { %379 = vst [vmem:[#allocation12 + $0x8] sm:$0xff] %v377_v33 }
 0x281   :  { %392 = dma.vmem_to_hbm [thread:$0]  %s385_s29, 256, %s387_s9, [#allocation5], %s629_s25, %s629_s25, %s630_s26  }
 0x282   :  { %620 = dma.done.wait [#allocation5], 256  }
 0x283   :  { %621 = vsyncadd [#allocation5], 4294967040 }
 0x284   :  { %397 = vsyncpa [#allocation4], 1 }
 0x285   :  { %398 = vsyncpa [#allocation7], 1 }
 0x286   :  { %399 = vsyncpa [#allocation10], 1 }
 0x287   :  { %400 = vsyncpa [#allocation5], 1 }

</bundles_post_ra>
